<compile_context>
chip_gen: v5e
topology: v5e:2x2
jax: 0.10.0
libtpu: 0.0.40
codegen_flags: <defaults>
</compile_context>

<pallas_src>
import jax
import jax.numpy as jnp
from jax.experimental import pallas as pl
from jax.experimental.pallas import tpu as pltpu

STATE_SIZE = 2
HIDDEN1 = 64
HIDDEN2 = 32
ACTION_SIZE = 8          # len(sleep_solutions)

LANES = 128              # TPU lane width

# f32 scalar slab (SCALAR_ROWS x 128), zero padded:
#   rows 0..1 : w1 (STATE_SIZE x HIDDEN1; lanes >= HIDDEN1 are 0)
#   row  2    : b1
#   row  3    : b2
#   row  4    : b3
#   rows 5..7 : zero padding (8-row aligned)
_W1_ROW = 0
_B1_ROW = 2
_B2_ROW = 3
_B3_ROW = 4
SCALAR_ROWS = 8

# bf16 MXU slab (2*LANES x 128), zero padded:
#   rows   0..127 : w2 padded to (128, 128)  (K-rows >= HIDDEN1 are 0)
#   rows 128..255 : w3 padded to (128, 128)  (K-rows >= HIDDEN2 are 0)
MXU_ROWS = 2 * LANES


def _qnet_kernel(x_ref, sp_ref, wp_ref, out_ref):
    x = x_ref[...].astype(jnp.float32)                      # (tb, 2)

    # ---- fc1 on the VPU (K == 2 -> two broadcast FMAs, no MXU trip) ----
    w1_0 = sp_ref[_W1_ROW:_W1_ROW + 1, :]                   # (1, 128)
    w1_1 = sp_ref[_W1_ROW + 1:_W1_ROW + 2, :]
    b1 = sp_ref[_B1_ROW:_B1_ROW + 1, :]
    h1 = x[:, 0:1] * w1_0 + x[:, 1:2] * w1_1 + b1           # (tb, 128)
    h1 = jnp.maximum(h1, 0.0)                                # lanes >= 64 stay 0

    # ---- fc2 on the MXU: bf16 x bf16 -> f32 accumulate (single pass) ----
    b2 = sp_ref[_B2_ROW:_B2_ROW + 1, :]
    h2 = jnp.dot(h1.astype(jnp.bfloat16), wp_ref[0:LANES, :],
                 preferred_element_type=jnp.float32) + b2
    h2 = jnp.maximum(h2, 0.0)                                # lanes >= 32 stay 0

    # ---- fc3 (no activation) ----
    b3 = sp_ref[_B3_ROW:_B3_ROW + 1, :]
    out = jnp.dot(h2.astype(jnp.bfloat16), wp_ref[LANES:2 * LANES, :],
                  preferred_element_type=jnp.float32) + b3   # (tb, 128)

    # Only the 8 real action columns go back to HBM.
    out_ref[...] = out[:, :ACTION_SIZE].astype(out_ref.dtype)


def _cdiv(a, b):
    return (a + b - 1) // b


def _round_up(x, m):
    return _cdiv(x, m) * m


def pack_params(params):
    """Pack w1,b1,w2,b2,w3,b3 ([in,out] layout) into (8,128) f32 + (256,128) bf16 slabs."""
    w1 = jnp.asarray(params["w1"], jnp.float32).reshape(STATE_SIZE, HIDDEN1)
    b1 = jnp.asarray(params["b1"], jnp.float32).reshape(HIDDEN1)
    w2 = jnp.asarray(params["w2"], jnp.float32).reshape(HIDDEN1, HIDDEN2)
    b2 = jnp.asarray(params["b2"], jnp.float32).reshape(HIDDEN2)
    w3 = jnp.asarray(params["w3"], jnp.float32).reshape(HIDDEN2, ACTION_SIZE)
    b3 = jnp.asarray(params["b3"], jnp.float32).reshape(ACTION_SIZE)

    scalar_slab = jnp.zeros((SCALAR_ROWS, LANES), jnp.float32)
    scalar_slab = scalar_slab.at[_W1_ROW:_W1_ROW + STATE_SIZE, :HIDDEN1].set(w1)
    scalar_slab = scalar_slab.at[_B1_ROW, :HIDDEN1].set(b1)
    scalar_slab = scalar_slab.at[_B2_ROW, :HIDDEN2].set(b2)
    scalar_slab = scalar_slab.at[_B3_ROW, :ACTION_SIZE].set(b3)

    mxu_slab = jnp.zeros((MXU_ROWS, LANES), jnp.float32)
    mxu_slab = mxu_slab.at[:HIDDEN1, :HIDDEN2].set(w2)
    mxu_slab = mxu_slab.at[LANES:LANES + HIDDEN2, :ACTION_SIZE].set(w3)
    return scalar_slab, mxu_slab.astype(jnp.bfloat16)


def qnetwork_forward(state, scalar_slab, mxu_slab, *, block_b=1024,
                     min_split_rows=256):
    """state: (B, STATE_SIZE) f32 -> Q-values (B, ACTION_SIZE) f32."""
    B = state.shape[0]
    state = state.astype(jnp.float32)

    # Balanced tile selection: minimal padding, and >= 2 grid steps for
    # large-enough batches so v7x's second TensorCore gets work.
    num_steps = max(1, _cdiv(B, block_b))
    if num_steps == 1 and B >= 2 * min_split_rows:
        num_steps = 2
    tb = _round_up(_cdiv(B, num_steps), 8)        # rows per step (multiple of 8)
    bp = num_steps * tb
    if bp != B:
        # Zero-padded rows keep h1/h2 zero-lane invariants and produce only
        # bias-derived values that the [:B] trim below discards.
        state = jnp.pad(state, ((0, bp - B), (0, 0)))

    flops = 2 * bp * (STATE_SIZE * HIDDEN1 + HIDDEN1 * HIDDEN2
                      + HIDDEN2 * ACTION_SIZE)
    bytes_accessed = (bp * STATE_SIZE * 4 + SCALAR_ROWS * LANES * 4
                      + MXU_ROWS * LANES * 2 + bp * ACTION_SIZE * 4)

    out = pl.pallas_call(
        _qnet_kernel,
        out_shape=jax.ShapeDtypeStruct((bp, ACTION_SIZE), jnp.float32),
        grid=(num_steps,),
        in_specs=[
            # activations blocked over batch
            pl.BlockSpec((tb, STATE_SIZE), lambda i: (i, 0)),
            # constant index_maps -> both param slabs stay VMEM-resident
            pl.BlockSpec((SCALAR_ROWS, LANES), lambda i: (0, 0)),
            pl.BlockSpec((MXU_ROWS, LANES), lambda i: (0, 0)),
        ],
        out_specs=pl.BlockSpec((tb, ACTION_SIZE), lambda i: (i, 0)),
        compiler_params=pltpu.CompilerParams(
            dimension_semantics=("parallel",)),
        cost_estimate=pl.CostEstimate(
            flops=flops, transcendentals=0, bytes_accessed=bytes_accessed),
    )(state, scalar_slab, mxu_slab)

    return out[:B] if bp != B else out


def init_params(key):
    """Mirror PyTorch nn.Linear default init: U[-1/sqrt(fan_in), 1/sqrt(fan_in)].
    Weights stored transposed relative to PyTorch: [in_features, out_features]."""
    ks = jax.random.split(key, 6)

    def linear(kw, kb, fan_in, fan_out):
        bound = 1.0 / jnp.sqrt(jnp.float32(fan_in))
        w = jax.random.uniform(kw, (fan_in, fan_out), jnp.float32, -bound, bound)
        b = jax.random.uniform(kb, (1, fan_out), jnp.float32, -bound, bound)
        return w, b

    w1, b1 = linear(ks[0], ks[1], STATE_SIZE, HIDDEN1)
    w2, b2 = linear(ks[2], ks[3], HIDDEN1, HIDDEN2)
    w3, b3 = linear(ks[4], ks[5], HIDDEN2, ACTION_SIZE)
    return {"w1": w1, "b1": b1, "w2": w2, "b2": b2, "w3": w3, "b3": b3}


def _reference_forward_f32(state, params):
    h1 = jnp.maximum(state @ params["w1"] + params["b1"], 0.0)
    h2 = jnp.maximum(h1 @ params["w2"] + params["b2"], 0.0)
    return h2 @ params["w3"] + params["b3"]


def _reference_forward_bf16(state, params):
    # Matches the kernel's numerics: bf16 MXU operands, f32 accumulation.
    h1 = jnp.maximum(state @ params["w1"] + params["b1"], 0.0)
    h2 = jnp.dot(h1.astype(jnp.bfloat16), params["w2"].astype(jnp.bfloat16),
                 preferred_element_type=jnp.float32) + params["b2"]
    h2 = jnp.maximum(h2, 0.0)
    return jnp.dot(h2.astype(jnp.bfloat16), params["w3"].astype(jnp.bfloat16),
                   preferred_element_type=jnp.float32) + params["b3"]


if __name__ == "__main__":
    key = jax.random.PRNGKey(0)
    k_params, k1, k2, k3 = jax.random.split(key, 4)

    params = init_params(k_params)
    scalar_slab, mxu_slab = pack_params(params)

    # (batch, rel/abs tolerance vs pure-f32 reference)
    test_batches = [(8, k1), (50, k2), (600, k3)]
    for batch, kb in test_batches:
        state = jax.random.normal(kb, (batch, STATE_SIZE), dtype=jnp.float32)
        out = jax.block_until_ready(qnetwork_forward(state, scalar_slab, mxu_slab))
        assert out.shape == (batch, ACTION_SIZE)
        assert out.dtype == jnp.float32

        # Tight check against a bf16-matched reference (same numerics).
        ref_bf16 = _reference_forward_bf16(state, params)
        assert jnp.allclose(out, ref_bf16, atol=5e-3, rtol=5e-3), \
            f"bf16-matched mismatch at batch={batch}"

        # Loose check against the pure-f32 PyTorch-equivalent forward
        # (bf16 MXU operands => ~1e-2 level deviation expected).
        ref_f32 = _reference_forward_f32(state, params)
        assert jnp.allclose(out, ref_f32, atol=5e-2, rtol=5e-2), \
            f"f32 reference mismatch at batch={batch}"

    print("KERNEL_OK")
</pallas_src>

<mosaic_0001>
module attributes {stable_mosaic.version = 11 : i64} {
  func.func @_qnet_kernel(%arg0: i32, %arg1: memref<8x2xf32, #tpu.memory_space<vmem>>, %arg2: memref<8x128xf32, #tpu.memory_space<vmem>>, %arg3: memref<256x128xbf16, #tpu.memory_space<vmem>>, %arg4: memref<8x8xf32, #tpu.memory_space<vmem>>) attributes {dimension_semantics = [#tpu.dimension_semantics<parallel>], iteration_bounds = array<i64: 1>, scalar_prefetch = 0 : i64, scratch_operands = 0 : i64, tpu.core_type = #tpu.core_type<tc>, window_params = [{transform_indices = @transform_0, window_bounds = array<i64: 8, 2>}, {pipeline_mode = #tpu.pipeline_mode<synchronous>, transform_indices = @transform_1, window_bounds = array<i64: 8, 128>}, {pipeline_mode = #tpu.pipeline_mode<synchronous>, transform_indices = @transform_2, window_bounds = array<i64: 256, 128>}, {transform_indices = @transform_3, window_bounds = array<i64: 8, 8>}]} {
    %c0 = arith.constant 0 : index
    %c0_0 = arith.constant 0 : index
    %0 = vector.load %arg1[%c0, %c0_0] : memref<8x2xf32, #tpu.memory_space<vmem>>, vector<8x2xf32>
    %c0_1 = arith.constant 0 : index
    %c0_2 = arith.constant 0 : index
    %1 = vector.load %arg2[%c0_1, %c0_2] : memref<8x128xf32, #tpu.memory_space<vmem>>, vector<1x128xf32>
    %c1 = arith.constant 1 : index
    %c0_3 = arith.constant 0 : index
    %2 = vector.load %arg2[%c1, %c0_3] : memref<8x128xf32, #tpu.memory_space<vmem>>, vector<1x128xf32>
    %c2 = arith.constant 2 : index
    %c0_4 = arith.constant 0 : index
    %3 = vector.load %arg2[%c2, %c0_4] : memref<8x128xf32, #tpu.memory_space<vmem>>, vector<1x128xf32>
    %4 = vector.extract_strided_slice %0 {offsets = [0, 0], sizes = [8, 1], strides = [1, 1]} : vector<8x2xf32> to vector<8x1xf32>
    %5 = vector.broadcast %4 : vector<8x1xf32> to vector<8x128xf32>
    %6 = vector.broadcast %1 : vector<1x128xf32> to vector<8x128xf32>
    %7 = arith.mulf %5, %6 : vector<8x128xf32>
    %8 = vector.extract_strided_slice %0 {offsets = [0, 1], sizes = [8, 1], strides = [1, 1]} : vector<8x2xf32> to vector<8x1xf32>
    %9 = vector.broadcast %8 : vector<8x1xf32> to vector<8x128xf32>
    %10 = vector.broadcast %2 : vector<1x128xf32> to vector<8x128xf32>
    %11 = arith.mulf %9, %10 : vector<8x128xf32>
    %12 = arith.addf %7, %11 : vector<8x128xf32>
    %13 = vector.broadcast %3 : vector<1x128xf32> to vector<8x128xf32>
    %14 = arith.addf %12, %13 : vector<8x128xf32>
    %cst = arith.constant 0.000000e+00 : f32
    %15 = vector.broadcast %cst : f32 to vector<8x128xf32>
    %16 = arith.maximumf %14, %15 : vector<8x128xf32>
    %c3 = arith.constant 3 : index
    %c0_5 = arith.constant 0 : index
    %17 = vector.load %arg2[%c3, %c0_5] : memref<8x128xf32, #tpu.memory_space<vmem>>, vector<1x128xf32>
    %18 = arith.truncf %16 : vector<8x128xf32> to vector<8x128xbf16>
    %c0_6 = arith.constant 0 : index
    %c0_7 = arith.constant 0 : index
    %19 = vector.load %arg3[%c0_6, %c0_7] : memref<256x128xbf16, #tpu.memory_space<vmem>>, vector<128x128xbf16>
    %cst_8 = arith.constant dense<0.000000e+00> : vector<8x128xf32>
    %20 = tpu.matmul %18, %19, %cst_8 {dimension_numbers = #tpu.dot_dimension_numbers<[1], [0], [0], [1], [0, 0, 1, 1], [], []>} : vector<8x128xbf16>, vector<128x128xbf16>, vector<8x128xf32> -> vector<8x128xf32>
    %21 = vector.broadcast %17 : vector<1x128xf32> to vector<8x128xf32>
    %22 = arith.addf %20, %21 : vector<8x128xf32>
    %cst_9 = arith.constant 0.000000e+00 : f32
    %23 = vector.broadcast %cst_9 : f32 to vector<8x128xf32>
    %24 = arith.maximumf %22, %23 : vector<8x128xf32>
    %c4 = arith.constant 4 : index
    %c0_10 = arith.constant 0 : index
    %25 = vector.load %arg2[%c4, %c0_10] : memref<8x128xf32, #tpu.memory_space<vmem>>, vector<1x128xf32>
    %26 = arith.truncf %24 : vector<8x128xf32> to vector<8x128xbf16>
    %c128 = arith.constant 128 : index
    %c0_11 = arith.constant 0 : index
    %27 = vector.load %arg3[%c128, %c0_11] : memref<256x128xbf16, #tpu.memory_space<vmem>>, vector<128x128xbf16>
    %cst_12 = arith.constant dense<0.000000e+00> : vector<8x128xf32>
    %28 = tpu.matmul %26, %27, %cst_12 {dimension_numbers = #tpu.dot_dimension_numbers<[1], [0], [0], [1], [0, 0, 1, 1], [], []>} : vector<8x128xbf16>, vector<128x128xbf16>, vector<8x128xf32> -> vector<8x128xf32>
    %29 = vector.broadcast %25 : vector<1x128xf32> to vector<8x128xf32>
    %30 = arith.addf %28, %29 : vector<8x128xf32>
    %31 = vector.extract_strided_slice %30 {offsets = [0, 0], sizes = [8, 8], strides = [1, 1]} : vector<8x128xf32> to vector<8x8xf32>
    %c0_13 = arith.constant 0 : index
    %c0_14 = arith.constant 0 : index
    %32 = vector.load %arg4[%c0_13, %c0_14] : memref<8x8xf32, #tpu.memory_space<vmem>>, vector<8x8xf32>
    tpu.vector_store %arg4[%c0_13, %c0_14], %31 {strides = array<i32>} : memref<8x8xf32, #tpu.memory_space<vmem>>, vector<8x8xf32>,
    return
  }
  func.func @transform_0(%arg0: i32) -> (i32, i32) {
    %c0_i32 = arith.constant 0 : i32
    %c0_i32_0 = arith.constant 0 : i32
    return %arg0, %c0_i32 : i32, i32
  }
  func.func @transform_1(%arg0: i32) -> (i32, i32) {
    %c0_i32 = arith.constant 0 : i32
    %c0_i32_0 = arith.constant 0 : i32
    %c0_i32_1 = arith.constant 0 : i32
    return %c0_i32, %c0_i32_0 : i32, i32
  }
  func.func @transform_2(%arg0: i32) -> (i32, i32) {
    %c0_i32 = arith.constant 0 : i32
    %c0_i32_0 = arith.constant 0 : i32
    %c0_i32_1 = arith.constant 0 : i32
    return %c0_i32, %c0_i32_0 : i32, i32
  }
  func.func @transform_3(%arg0: i32) -> (i32, i32) {
    %c0_i32 = arith.constant 0 : i32
    %c0_i32_0 = arith.constant 0 : i32
    return %arg0, %c0_i32 : i32, i32
  }
}

</mosaic_0001>

<bundles_post_ra>
// kernel: tpu_custom_call.1
= control target key start
LH: loop header
LB: loop body
LE: loop exit
PB: predicated region body
PF: predicated region fallthrough
CT: control target
= control target key end

     0   :  { %8 = vsyncpa [#allocation3], 0  ;;  %s427_s0 = inlined_call_operand.vmem [shape: f32[8,2], index: 0, kind: input, shape index: {}]   ;;  %s428_s1 = inlined_call_operand.vmem [shape: f32[8,128], index: 1, kind: input, shape index: {}]   ;;  %s429_s2 = inlined_call_operand.hbm [shape: bf16[256,128], index: 2, kind: input, shape index: {}]   ;;  %s430_s3 = inlined_call_operand.hbm [shape: f32[8,8], index: 3, kind: output, shape index: {}]  }
   0x1   :  { %9 = vsyncpa [#allocation4], 0  ;;  %s18_s14 = sshll.u32 %s429_s2, 4  ;;  %s377_s15 = smov [#allocation2]   ;;  %s19_s14 = int_to_ptr.hbm [resolvable:$true] %s18_s14 }
   0x2   :  { %s20_s16 = sshll.u32 %s377_s15, 4  ;;  %s378_s17 = smov 64   ;;  %s21_s16 = int_to_ptr.vmem [resolvable:$true] %s20_s16 }
   0x3   :  { %s379_s18 = smov 4  }
   0x4   :  { %26 = dma.hbm_to_vmem [thread:$0]  %s19_s14, 2048, %s21_s16, [#allocation3], %s378_s17, %s378_s17, %s379_s18  }
   0x5   :  { %373 = dma.done.wait [#allocation3], 2048  }
   0x6   :  { %374 = vsyncadd [#allocation3], 4294965248  ;;  %v380_v0 = vmov 0   ;;  %v31_v1 = vld [vmem:[%s427_s0] sm:$0xff]  ;;  %v303_v2 = vld [vmem:[#allocation2 + $0x38] sm:$0xff]  ;;  %v381_v5 = vmov 1  }
   0x7   :  { %318 = vset.pattern.permute.xlu0 %v380_v0  ;;  %v302_v3 = vld [vmem:[#allocation2 + $0x30] sm:$0xff]  ;;  %119 = vmatpush.bf16.msra.mxu0 %v303_v2  ;;  %v301_v4 = vld [vmem:[#allocation2 + $0x28] sm:$0xff]  ;;  %v300_v6 = vld [vmem:[#allocation2 + $0x20] sm:$0xff]  ;;  %s382_s29 = smov [#allocation5]   ;;  %s222_s6 = sshll.u32 %s430_s3, 4  ;;  %vm213_vm0 = vcmask 64512   ;;  %s223_s6 = int_to_ptr.hbm [resolvable:$true] %s222_s6 }
   0x8   :  { %37 = vperm.xlu0 %318, %v31_v1   ;;  %v299_v7 = vld [vmem:[#allocation2 + $0x18] sm:$0xff]  ;;  %v298_v8 = vld [vmem:[#allocation2 + $0x10] sm:$0xff]  ;;  %v297_v9 = vld [vmem:[#allocation2 + $0x8] sm:$0xff]  ;;  %s220_s30 = sshll.u32 %s382_s29, 4  ;;  %s221_s30 = int_to_ptr.vmem [resolvable:$true] %s220_s30 }
   0x9   :  { %v296_v10 = vld [vmem:[#allocation2] sm:$0xff]  ;;  %v311_v11 = vld [vmem:[#allocation2 + $0x78] sm:$0xff]  ;;  %v310_v12 = vld [vmem:[#allocation2 + $0x70] sm:$0xff] }
   0xa   :  { %200 = vmatpush.bf16.msra.mxu1 %v311_v11  ;;  %v309_v13 = vld [vmem:[#allocation2 + $0x68] sm:$0xff]  ;;  %v308_v14 = vld [vmem:[#allocation2 + $0x60] sm:$0xff]  ;;  %v307_v16 = vld [vmem:[#allocation2 + $0x58] sm:$0xff] }
   0xb   :  { %120 = vmatpush.bf16.msra.mxu0 %v302_v3  ;;  %v320_v17 = vld [vmem:[%s428_s1] ss:$0 sm:$0xff]  ;;  %v321_v18 = vld [vmem:[%s428_s1 + $0x1] ss:$0 sm:$0xff]  ;;  %v306_v19 = vld [vmem:[#allocation2 + $0x50] sm:$0xff] }
   0xc   :  { %v322_v23 = vld [vmem:[%s428_s1 + $0x2] ss:$0 sm:$0xff]  ;;  %v305_v28 = vld [vmem:[#allocation2 + $0x48] sm:$0xff]  ;;  %v323_v30 = vld [vmem:[%s428_s1 + $0x3] ss:$0 sm:$0xff] }
   0xd   :  { %v304_v29 = vld [vmem:[#allocation2 + $0x40] sm:$0xff] }
   0xe   :  { %201 = vmatpush.bf16.msra.mxu1 %v310_v12  ;;  %v324_v36 = vld [vmem:[%s428_s1 + $0x4] ss:$0 sm:$0xff] }
   0xf   :  { %121 = vmatpush.bf16.msra.mxu0 %v301_v4 }
  0x10   :  { %319 = vset.pattern.permute.xlu0 %v381_v5 }
  0x11   :  { %43 = vperm.xlu0 %319, %v31_v1  }
  0x12   :  { %202 = vmatpush.bf16.msra.mxu1 %v309_v13 }
  0x13   :  { %122 = vmatpush.bf16.msra.mxu0 %v300_v6 }
  0x16   :  { %203 = vmatpush.bf16.msra.mxu1 %v308_v14 }
  0x17   :  { %123 = vmatpush.bf16.msra.mxu0 %v299_v7 }
  0x1a   :  { %204 = vmatpush.bf16.msra.mxu1 %v307_v16 }
  0x1b   :  { %124 = vmatpush.bf16.msra.mxu0 %v298_v8 }
  0x1e   :  { %205 = vmatpush.bf16.msra.mxu1 %v306_v19 }
  0x1f   :  { %125 = vmatpush.bf16.msra.mxu0 %v297_v9 }
  0x22   :  { %206 = vmatpush.bf16.msra.mxu1 %v305_v28 }
  0x23   :  { %126 = vmatpush.bf16.msra.mxu0 %v296_v10 }
  0x26   :  { %207 = vmatpush.bf16.msra.mxu1 %v304_v29 }
  0x7a   :  { %v38_v15 = vpop.permute.xlu0 %37 }
  0x7b   :  { %v41_v21 = vmul.f32 %v320_v17, %v38_v15 }
  0x83   :  { %v44_v20 = vpop.permute.xlu0 %43 }
  0x84   :  { %v47_v22 = vmul.f32 %v321_v18, %v44_v20 }
  0x86   :  { %v48_v24 = vadd.f32 %v47_v22, %v41_v21 }
  0x88   :  { %v50_v25 = vadd.f32 %v322_v23, %v48_v24 }
  0x8a   :  { %v51_v26 = vmax.f32 %v50_v25, 0.0 }
  0x8c   :  { %v53_v27 = vpack.c.bf16 %v51_v26, %v51_v26 }
  0x8e   :  { %127 = vmatmul.bf16.vlgmr.msra.gmra.mxu0 %v53_v27 }
 0x10b   :  { %v128_v31 = vpop.f32.mrf.mxu0 }
 0x10c   :  { %v129_v32 = vadd.f32 %v323_v30, %v128_v31 }
 0x10e   :  { %v132_v33 = vmax.f32 %v129_v32, 0.0 }
 0x110   :  { %v134_v34 = vpack.c.bf16 %v132_v33, %v132_v33 }
 0x112   :  { %208 = vmatmul.bf16.vlgmr.msra.gmra.mxu1 %v134_v34 }
 0x113   :  { %v130_v35 = vpop.f32.mrf.mxu0 }
 0x18f   :  { %v209_v37 = vpop.f32.mrf.mxu1 }
 0x190   :  { %v210_v38 = vadd.f32 %v324_v36, %v209_v37 }
 0x192   :  { %214 = vst.msk [vmem:[#allocation5] sm:$0xff] %vm213_vm0, %v210_v38 }
 0x193   :  { %225 = dma.vmem_to_hbm [thread:$0]  %s221_s30, 128, %s223_s6, [#allocation4]  }
 0x197   :  { %v211_v39 = vpop.f32.mrf.mxu1 }
 0x198   :  { %375 = dma.done.wait [#allocation4], 128  }
 0x199   :  { %376 = vsyncadd [#allocation4], 4294967168 }
 0x19a   :  { %230 = vsyncpa [#allocation3], 1 }
 0x19b   :  { %231 = vsyncpa [#allocation4], 1 }

</bundles_post_ra>
